<compile_context>
chip_gen: v5e
topology: v5e:2x2
jax: 0.10.0
libtpu: 0.0.40
codegen_flags: <defaults>
</compile_context>

<pallas_src>
import functools
import math

import jax
import jax.numpy as jnp
import numpy as np
from jax.experimental import pallas as pl
from jax.experimental.pallas import tpu as pltpu

# ----- model hyperparameters (small, consistent with the module) -----
B = 2          # batch
S = 8          # sequence length
H = 4          # number of heads
D_MODEL = 32   # d_model


def _mha_kernel(q_ref, k_ref, v_ref, wqkv_ref, bqkv_ref, o_ref, *, batch, seq, heads):
    """Single grid step: full batch in VMEM.

    q_ref/k_ref/v_ref: (B*S, D)   wqkv_ref: (3, D, D)   bqkv_ref: (3, 1, D)
    o_ref:             (B, S, D)
    """
    d_model = q_ref.shape[-1]
    d_k = d_model // heads

    # Fused-batch linear projections (MXU) + bias. The 1/sqrt(d_k) attention scale
    # is already folded into wqkv_ref[0] / bqkv_ref[0] by the wrapper.
    qp = jnp.dot(q_ref[...], wqkv_ref[0], preferred_element_type=jnp.float32) + bqkv_ref[0]
    kp = jnp.dot(k_ref[...], wqkv_ref[1], preferred_element_type=jnp.float32) + bqkv_ref[1]
    vp = jnp.dot(v_ref[...], wqkv_ref[2], preferred_element_type=jnp.float32) + bqkv_ref[2]

    # Un-fold the batch axis. Sublane-tile-aligned split (B*S -> (B, S) with S a
    # multiple of the 8-sublane tile here); lane (last) dim unchanged.
    qp = qp.reshape(batch, seq, d_model)
    kp = kp.reshape(batch, seq, d_model)
    vp = vp.reshape(batch, seq, d_model)

    head_outs = []
    for h in range(heads):                       # static compile-time loop over heads
        lo = h * d_k
        qh = qp[:, :, lo:lo + d_k]               # (B, S, d_k)
        kh = kp[:, :, lo:lo + d_k]
        vh = vp[:, :, lo:lo + d_k]

        # scores (already scaled) — batched over the batch axis.
        s = jnp.einsum('bqd,bkd->bqk', qh, kh, preferred_element_type=jnp.float32)
        # numerically-stable softmax over the key axis
        s = s - jnp.max(s, axis=-1, keepdims=True)
        e = jnp.exp(s)
        p = e * pl.reciprocal(jnp.sum(e, axis=-1, keepdims=True), approx=False)
        head_outs.append(
            jnp.einsum('bqk,bkd->bqd', p, vh, preferred_element_type=jnp.float32))

    # Concatenate heads along lanes -> (B, S, H*d_k), same layout as
    # x.transpose(1,2).contiguous().view(B, S, h*d_k) in the PyTorch module.
    o_ref[...] = jnp.concatenate(head_outs, axis=-1).astype(o_ref.dtype)


def multi_headed_attention(q, k, v, wq, wk, wv, bq, bk, bv, *, heads=H):
    batch, seq, d_model = q.shape
    d_k = d_model // heads
    scale = 1.0 / math.sqrt(d_k)

    # One-time weight transform: fold the attention scale into the Q projection.
    wqkv = jnp.stack([wq * scale, wk, wv], axis=0)       # (3, D, D)
    bqkv = jnp.stack([bq * scale, bk, bv], axis=0)       # (3, 1, D)

    # Fold (B, S) into one sublane axis so each projection is a single matmul.
    q2 = q.reshape(batch * seq, d_model)
    k2 = k.reshape(batch * seq, d_model)
    v2 = v.reshape(batch * seq, d_model)

    kernel = functools.partial(_mha_kernel, batch=batch, seq=seq, heads=heads)

    flat_spec = pl.BlockSpec((batch * seq, d_model), lambda i: (0, 0))
    w_spec = pl.BlockSpec((3, d_model, d_model), lambda i: (0, 0, 0))
    b_spec = pl.BlockSpec((3, 1, d_model), lambda i: (0, 0, 0))
    out_spec = pl.BlockSpec((batch, seq, d_model), lambda i: (0, 0, 0))

    return pl.pallas_call(
        kernel,
        out_shape=jax.ShapeDtypeStruct((batch, seq, d_model), q.dtype),
        grid_spec=pltpu.PrefetchScalarGridSpec(
            num_scalar_prefetch=0,
            grid=(1,),                            # single step: all data fits in VMEM
            in_specs=[flat_spec, flat_spec, flat_spec, w_spec, b_spec],
            out_specs=out_spec,
        ),
        compiler_params=pltpu.CompilerParams(
            dimension_semantics=("arbitrary",)),
    )(q2, k2, v2, wqkv, bqkv)


def ref_multi_headed_attention(q, k, v, wq, wk, wv, bq, bk, bv, *, heads=H):
    """Pure-JAX reference mirroring the PyTorch forward (dropout = identity)."""
    Bq, Sq, D = q.shape
    dk = D // heads

    def proj(x, w, b):
        y = x @ w + b                                        # (B, S, D)
        return y.reshape(Bq, Sq, heads, dk).transpose(0, 2, 1, 3)  # (B, H, S, dk)

    qp, kp, vp = proj(q, wq, bq), proj(k, wk, bk), proj(v, wv, bv)
    scores = jnp.einsum("bhqd,bhkd->bhqk", qp, kp) / math.sqrt(dk)
    p = jax.nn.softmax(scores, axis=-1)
    x = jnp.einsum("bhqk,bhkd->bhqd", p, vp)                 # (B, H, S, dk)
    return x.transpose(0, 2, 1, 3).reshape(Bq, Sq, heads * dk)


if __name__ == "__main__":
    key = jax.random.PRNGKey(0)
    keys = jax.random.split(key, 9)

    # nn.Linear-style init: uniform(-1/sqrt(d_model), 1/sqrt(d_model))
    bound = 1.0 / math.sqrt(D_MODEL)
    wq = jax.random.uniform(keys[0], (D_MODEL, D_MODEL), jnp.float32, -bound, bound)
    wk = jax.random.uniform(keys[1], (D_MODEL, D_MODEL), jnp.float32, -bound, bound)
    wv = jax.random.uniform(keys[2], (D_MODEL, D_MODEL), jnp.float32, -bound, bound)
    bq = jax.random.uniform(keys[3], (1, D_MODEL), jnp.float32, -bound, bound)
    bk = jax.random.uniform(keys[4], (1, D_MODEL), jnp.float32, -bound, bound)
    bv = jax.random.uniform(keys[5], (1, D_MODEL), jnp.float32, -bound, bound)

    q = jax.random.normal(keys[6], (B, S, D_MODEL), jnp.float32)
    k = jax.random.normal(keys[7], (B, S, D_MODEL), jnp.float32)
    v = jax.random.normal(keys[8], (B, S, D_MODEL), jnp.float32)

    out = multi_headed_attention(q, k, v, wq, wk, wv, bq, bk, bv)
    out = jax.block_until_ready(out)

    ref = ref_multi_headed_attention(q, k, v, wq, wk, wv, bq, bk, bv)
    np.testing.assert_allclose(np.asarray(out), np.asarray(ref), rtol=1e-5, atol=1e-5)

    print("KERNEL_OK")
</pallas_src>

<mosaic_0001>
module attributes {stable_mosaic.version = 11 : i64} {
  func.func @_mha_kernel(%arg0: i32, %arg1: memref<16x32xf32, #tpu.memory_space<vmem>>, %arg2: memref<16x32xf32, #tpu.memory_space<vmem>>, %arg3: memref<16x32xf32, #tpu.memory_space<vmem>>, %arg4: memref<3x32x32xf32, #tpu.memory_space<vmem>>, %arg5: memref<3x1x32xf32, #tpu.memory_space<vmem>>, %arg6: memref<2x8x32xf32, #tpu.memory_space<vmem>>) attributes {dimension_semantics = [#tpu.dimension_semantics<arbitrary>], iteration_bounds = array<i64: 1>, scalar_prefetch = 0 : i64, scratch_operands = 0 : i64, tpu.core_type = #tpu.core_type<tc>, window_params = [{pipeline_mode = #tpu.pipeline_mode<synchronous>, transform_indices = @transform_0, window_bounds = array<i64: 16, 32>}, {pipeline_mode = #tpu.pipeline_mode<synchronous>, transform_indices = @transform_1, window_bounds = array<i64: 16, 32>}, {pipeline_mode = #tpu.pipeline_mode<synchronous>, transform_indices = @transform_2, window_bounds = array<i64: 16, 32>}, {pipeline_mode = #tpu.pipeline_mode<synchronous>, transform_indices = @transform_3, window_bounds = array<i64: 3, 32, 32>}, {pipeline_mode = #tpu.pipeline_mode<synchronous>, transform_indices = @transform_4, window_bounds = array<i64: 3, 1, 32>}, {pipeline_mode = #tpu.pipeline_mode<synchronous>, transform_indices = @transform_5, window_bounds = array<i64: 2, 8, 32>}]} {
    %c0 = arith.constant 0 : index
    %c0_0 = arith.constant 0 : index
    %0 = vector.load %arg1[%c0, %c0_0] : memref<16x32xf32, #tpu.memory_space<vmem>>, vector<16x32xf32>
    %c0_1 = arith.constant 0 : index
    %c0_2 = arith.constant 0 : index
    %c0_3 = arith.constant 0 : index
    %1 = vector.load %arg4[%c0_1, %c0_2, %c0_3] : memref<3x32x32xf32, #tpu.memory_space<vmem>>, vector<1x32x32xf32>
    %2 = vector.shape_cast %1 : vector<1x32x32xf32> to vector<32x32xf32>
    %cst = arith.constant dense<0.000000e+00> : vector<16x32xf32>
    %3 = tpu.matmul %0, %2, %cst {dimension_numbers = #tpu.dot_dimension_numbers<[1], [0], [0], [1], [0, 0, 1, 1], [], []>} : vector<16x32xf32>, vector<32x32xf32>, vector<16x32xf32> -> vector<16x32xf32>
    %c0_4 = arith.constant 0 : index
    %c0_5 = arith.constant 0 : index
    %c0_6 = arith.constant 0 : index
    %4 = vector.load %arg5[%c0_4, %c0_5, %c0_6] : memref<3x1x32xf32, #tpu.memory_space<vmem>>, vector<1x1x32xf32>
    %5 = vector.shape_cast %4 : vector<1x1x32xf32> to vector<1x32xf32>
    %6 = vector.broadcast %5 : vector<1x32xf32> to vector<16x32xf32>
    %7 = arith.addf %3, %6 : vector<16x32xf32>
    %c0_7 = arith.constant 0 : index
    %c0_8 = arith.constant 0 : index
    %8 = vector.load %arg2[%c0_7, %c0_8] : memref<16x32xf32, #tpu.memory_space<vmem>>, vector<16x32xf32>
    %c1 = arith.constant 1 : index
    %c0_9 = arith.constant 0 : index
    %c0_10 = arith.constant 0 : index
    %9 = vector.load %arg4[%c1, %c0_9, %c0_10] : memref<3x32x32xf32, #tpu.memory_space<vmem>>, vector<1x32x32xf32>
    %10 = vector.shape_cast %9 : vector<1x32x32xf32> to vector<32x32xf32>
    %cst_11 = arith.constant dense<0.000000e+00> : vector<16x32xf32>
    %11 = tpu.matmul %8, %10, %cst_11 {dimension_numbers = #tpu.dot_dimension_numbers<[1], [0], [0], [1], [0, 0, 1, 1], [], []>} : vector<16x32xf32>, vector<32x32xf32>, vector<16x32xf32> -> vector<16x32xf32>
    %c1_12 = arith.constant 1 : index
    %c0_13 = arith.constant 0 : index
    %c0_14 = arith.constant 0 : index
    %12 = vector.load %arg5[%c1_12, %c0_13, %c0_14] : memref<3x1x32xf32, #tpu.memory_space<vmem>>, vector<1x1x32xf32>
    %13 = vector.shape_cast %12 : vector<1x1x32xf32> to vector<1x32xf32>
    %14 = vector.broadcast %13 : vector<1x32xf32> to vector<16x32xf32>
    %15 = arith.addf %11, %14 : vector<16x32xf32>
    %c0_15 = arith.constant 0 : index
    %c0_16 = arith.constant 0 : index
    %16 = vector.load %arg3[%c0_15, %c0_16] : memref<16x32xf32, #tpu.memory_space<vmem>>, vector<16x32xf32>
    %c2 = arith.constant 2 : index
    %c0_17 = arith.constant 0 : index
    %c0_18 = arith.constant 0 : index
    %17 = vector.load %arg4[%c2, %c0_17, %c0_18] : memref<3x32x32xf32, #tpu.memory_space<vmem>>, vector<1x32x32xf32>
    %18 = vector.shape_cast %17 : vector<1x32x32xf32> to vector<32x32xf32>
    %cst_19 = arith.constant dense<0.000000e+00> : vector<16x32xf32>
    %19 = tpu.matmul %16, %18, %cst_19 {dimension_numbers = #tpu.dot_dimension_numbers<[1], [0], [0], [1], [0, 0, 1, 1], [], []>} : vector<16x32xf32>, vector<32x32xf32>, vector<16x32xf32> -> vector<16x32xf32>
    %c2_20 = arith.constant 2 : index
    %c0_21 = arith.constant 0 : index
    %c0_22 = arith.constant 0 : index
    %20 = vector.load %arg5[%c2_20, %c0_21, %c0_22] : memref<3x1x32xf32, #tpu.memory_space<vmem>>, vector<1x1x32xf32>
    %21 = vector.shape_cast %20 : vector<1x1x32xf32> to vector<1x32xf32>
    %22 = vector.broadcast %21 : vector<1x32xf32> to vector<16x32xf32>
    %23 = arith.addf %19, %22 : vector<16x32xf32>
    %24 = vector.shape_cast %7 : vector<16x32xf32> to vector<2x8x32xf32>
    %25 = vector.shape_cast %15 : vector<16x32xf32> to vector<2x8x32xf32>
    %26 = vector.shape_cast %23 : vector<16x32xf32> to vector<2x8x32xf32>
    %27 = vector.extract_strided_slice %24 {offsets = [0, 0, 0], sizes = [2, 8, 8], strides = [1, 1, 1]} : vector<2x8x32xf32> to vector<2x8x8xf32>
    %28 = vector.extract_strided_slice %25 {offsets = [0, 0, 0], sizes = [2, 8, 8], strides = [1, 1, 1]} : vector<2x8x32xf32> to vector<2x8x8xf32>
    %29 = vector.extract_strided_slice %26 {offsets = [0, 0, 0], sizes = [2, 8, 8], strides = [1, 1, 1]} : vector<2x8x32xf32> to vector<2x8x8xf32>
    "tpu.trace_start"() <{level = 10 : i32, message = "bqd,bkd->bqk"}> : () -> ()
    %cst_23 = arith.constant dense<0.000000e+00> : vector<2x8x8xf32>
    %30 = tpu.matmul %27, %28, %cst_23 {dimension_numbers = #tpu.dot_dimension_numbers<[2], [2], [1], [1], [0, 0, 0, 1, 1, 1], [0], [0]>} : vector<2x8x8xf32>, vector<2x8x8xf32>, vector<2x8x8xf32> -> vector<2x8x8xf32>
    "tpu.trace_stop"() : () -> ()
    %cst_24 = arith.constant dense<0xFF800000> : vector<2x8xf32>
    %31 = vector.multi_reduction <maximumf>, %30, %cst_24 [2] : vector<2x8x8xf32> to vector<2x8xf32>
    %32 = vector.shape_cast %31 : vector<2x8xf32> to vector<2x8x1xf32>
    %33 = vector.broadcast %32 : vector<2x8x1xf32> to vector<2x8x8xf32>
    %34 = arith.subf %30, %33 : vector<2x8x8xf32>
    %35 = math.exp %34 : vector<2x8x8xf32>
    %cst_25 = arith.constant dense<0.000000e+00> : vector<2x8xf32>
    %36 = vector.multi_reduction <add>, %35, %cst_25 [2] : vector<2x8x8xf32> to vector<2x8xf32>
    %37 = vector.shape_cast %36 : vector<2x8xf32> to vector<2x8x1xf32>
    %38 = tpu.reciprocal %37 : vector<2x8x1xf32> -> vector<2x8x1xf32>
    %39 = vector.broadcast %38 : vector<2x8x1xf32> to vector<2x8x8xf32>
    %40 = arith.mulf %35, %39 : vector<2x8x8xf32>
    "tpu.trace_start"() <{level = 10 : i32, message = "bqk,bkd->bqd"}> : () -> ()
    %cst_26 = arith.constant dense<0.000000e+00> : vector<2x8x8xf32>
    %41 = tpu.matmul %40, %29, %cst_26 {dimension_numbers = #tpu.dot_dimension_numbers<[2], [1], [1], [2], [0, 0, 0, 1, 1, 2], [0], [0]>} : vector<2x8x8xf32>, vector<2x8x8xf32>, vector<2x8x8xf32> -> vector<2x8x8xf32>
    "tpu.trace_stop"() : () -> ()
    %42 = vector.extract_strided_slice %24 {offsets = [0, 0, 8], sizes = [2, 8, 8], strides = [1, 1, 1]} : vector<2x8x32xf32> to vector<2x8x8xf32>
    %43 = vector.extract_strided_slice %25 {offsets = [0, 0, 8], sizes = [2, 8, 8], strides = [1, 1, 1]} : vector<2x8x32xf32> to vector<2x8x8xf32>
    %44 = vector.extract_strided_slice %26 {offsets = [0, 0, 8], sizes = [2, 8, 8], strides = [1, 1, 1]} : vector<2x8x32xf32> to vector<2x8x8xf32>
    "tpu.trace_start"() <{level = 10 : i32, message = "bqd,bkd->bqk"}> : () -> ()
    %cst_27 = arith.constant dense<0.000000e+00> : vector<2x8x8xf32>
    %45 = tpu.matmul %42, %43, %cst_27 {dimension_numbers = #tpu.dot_dimension_numbers<[2], [2], [1], [1], [0, 0, 0, 1, 1, 1], [0], [0]>} : vector<2x8x8xf32>, vector<2x8x8xf32>, vector<2x8x8xf32> -> vector<2x8x8xf32>
    "tpu.trace_stop"() : () -> ()
    %cst_28 = arith.constant dense<0xFF800000> : vector<2x8xf32>
    %46 = vector.multi_reduction <maximumf>, %45, %cst_28 [2] : vector<2x8x8xf32> to vector<2x8xf32>
    %47 = vector.shape_cast %46 : vector<2x8xf32> to vector<2x8x1xf32>
    %48 = vector.broadcast %47 : vector<2x8x1xf32> to vector<2x8x8xf32>
    %49 = arith.subf %45, %48 : vector<2x8x8xf32>
    %50 = math.exp %49 : vector<2x8x8xf32>
    %cst_29 = arith.constant dense<0.000000e+00> : vector<2x8xf32>
    %51 = vector.multi_reduction <add>, %50, %cst_29 [2] : vector<2x8x8xf32> to vector<2x8xf32>
    %52 = vector.shape_cast %51 : vector<2x8xf32> to vector<2x8x1xf32>
    %53 = tpu.reciprocal %52 : vector<2x8x1xf32> -> vector<2x8x1xf32>
    %54 = vector.broadcast %53 : vector<2x8x1xf32> to vector<2x8x8xf32>
    %55 = arith.mulf %50, %54 : vector<2x8x8xf32>
    "tpu.trace_start"() <{level = 10 : i32, message = "bqk,bkd->bqd"}> : () -> ()
    %cst_30 = arith.constant dense<0.000000e+00> : vector<2x8x8xf32>
    %56 = tpu.matmul %55, %44, %cst_30 {dimension_numbers = #tpu.dot_dimension_numbers<[2], [1], [1], [2], [0, 0, 0, 1, 1, 2], [0], [0]>} : vector<2x8x8xf32>, vector<2x8x8xf32>, vector<2x8x8xf32> -> vector<2x8x8xf32>
    "tpu.trace_stop"() : () -> ()
    %57 = vector.extract_strided_slice %24 {offsets = [0, 0, 16], sizes = [2, 8, 8], strides = [1, 1, 1]} : vector<2x8x32xf32> to vector<2x8x8xf32>
    %58 = vector.extract_strided_slice %25 {offsets = [0, 0, 16], sizes = [2, 8, 8], strides = [1, 1, 1]} : vector<2x8x32xf32> to vector<2x8x8xf32>
    %59 = vector.extract_strided_slice %26 {offsets = [0, 0, 16], sizes = [2, 8, 8], strides = [1, 1, 1]} : vector<2x8x32xf32> to vector<2x8x8xf32>
    "tpu.trace_start"() <{level = 10 : i32, message = "bqd,bkd->bqk"}> : () -> ()
    %cst_31 = arith.constant dense<0.000000e+00> : vector<2x8x8xf32>
    %60 = tpu.matmul %57, %58, %cst_31 {dimension_numbers = #tpu.dot_dimension_numbers<[2], [2], [1], [1], [0, 0, 0, 1, 1, 1], [0], [0]>} : vector<2x8x8xf32>, vector<2x8x8xf32>, vector<2x8x8xf32> -> vector<2x8x8xf32>
    "tpu.trace_stop"() : () -> ()
    %cst_32 = arith.constant dense<0xFF800000> : vector<2x8xf32>
    %61 = vector.multi_reduction <maximumf>, %60, %cst_32 [2] : vector<2x8x8xf32> to vector<2x8xf32>
    %62 = vector.shape_cast %61 : vector<2x8xf32> to vector<2x8x1xf32>
    %63 = vector.broadcast %62 : vector<2x8x1xf32> to vector<2x8x8xf32>
    %64 = arith.subf %60, %63 : vector<2x8x8xf32>
    %65 = math.exp %64 : vector<2x8x8xf32>
    %cst_33 = arith.constant dense<0.000000e+00> : vector<2x8xf32>
    %66 = vector.multi_reduction <add>, %65, %cst_33 [2] : vector<2x8x8xf32> to vector<2x8xf32>
    %67 = vector.shape_cast %66 : vector<2x8xf32> to vector<2x8x1xf32>
    %68 = tpu.reciprocal %67 : vector<2x8x1xf32> -> vector<2x8x1xf32>
    %69 = vector.broadcast %68 : vector<2x8x1xf32> to vector<2x8x8xf32>
    %70 = arith.mulf %65, %69 : vector<2x8x8xf32>
    "tpu.trace_start"() <{level = 10 : i32, message = "bqk,bkd->bqd"}> : () -> ()
    %cst_34 = arith.constant dense<0.000000e+00> : vector<2x8x8xf32>
    %71 = tpu.matmul %70, %59, %cst_34 {dimension_numbers = #tpu.dot_dimension_numbers<[2], [1], [1], [2], [0, 0, 0, 1, 1, 2], [0], [0]>} : vector<2x8x8xf32>, vector<2x8x8xf32>, vector<2x8x8xf32> -> vector<2x8x8xf32>
    "tpu.trace_stop"() : () -> ()
    %72 = vector.extract_strided_slice %24 {offsets = [0, 0, 24], sizes = [2, 8, 8], strides = [1, 1, 1]} : vector<2x8x32xf32> to vector<2x8x8xf32>
    %73 = vector.extract_strided_slice %25 {offsets = [0, 0, 24], sizes = [2, 8, 8], strides = [1, 1, 1]} : vector<2x8x32xf32> to vector<2x8x8xf32>
    %74 = vector.extract_strided_slice %26 {offsets = [0, 0, 24], sizes = [2, 8, 8], strides = [1, 1, 1]} : vector<2x8x32xf32> to vector<2x8x8xf32>
    "tpu.trace_start"() <{level = 10 : i32, message = "bqd,bkd->bqk"}> : () -> ()
    %cst_35 = arith.constant dense<0.000000e+00> : vector<2x8x8xf32>
    %75 = tpu.matmul %72, %73, %cst_35 {dimension_numbers = #tpu.dot_dimension_numbers<[2], [2], [1], [1], [0, 0, 0, 1, 1, 1], [0], [0]>} : vector<2x8x8xf32>, vector<2x8x8xf32>, vector<2x8x8xf32> -> vector<2x8x8xf32>
    "tpu.trace_stop"() : () -> ()
    %cst_36 = arith.constant dense<0xFF800000> : vector<2x8xf32>
    %76 = vector.multi_reduction <maximumf>, %75, %cst_36 [2] : vector<2x8x8xf32> to vector<2x8xf32>
    %77 = vector.shape_cast %76 : vector<2x8xf32> to vector<2x8x1xf32>
    %78 = vector.broadcast %77 : vector<2x8x1xf32> to vector<2x8x8xf32>
    %79 = arith.subf %75, %78 : vector<2x8x8xf32>
    %80 = math.exp %79 : vector<2x8x8xf32>
    %cst_37 = arith.constant dense<0.000000e+00> : vector<2x8xf32>
    %81 = vector.multi_reduction <add>, %80, %cst_37 [2] : vector<2x8x8xf32> to vector<2x8xf32>
    %82 = vector.shape_cast %81 : vector<2x8xf32> to vector<2x8x1xf32>
    %83 = tpu.reciprocal %82 : vector<2x8x1xf32> -> vector<2x8x1xf32>
    %84 = vector.broadcast %83 : vector<2x8x1xf32> to vector<2x8x8xf32>
    %85 = arith.mulf %80, %84 : vector<2x8x8xf32>
    "tpu.trace_start"() <{level = 10 : i32, message = "bqk,bkd->bqd"}> : () -> ()
    %cst_38 = arith.constant dense<0.000000e+00> : vector<2x8x8xf32>
    %86 = tpu.matmul %85, %74, %cst_38 {dimension_numbers = #tpu.dot_dimension_numbers<[2], [1], [1], [2], [0, 0, 0, 1, 1, 2], [0], [0]>} : vector<2x8x8xf32>, vector<2x8x8xf32>, vector<2x8x8xf32> -> vector<2x8x8xf32>
    "tpu.trace_stop"() : () -> ()
    %87 = tpu.concatenate %41, %56, %71, %86 in 2 : vector<2x8x8xf32>, vector<2x8x8xf32>, vector<2x8x8xf32>, vector<2x8x8xf32> -> vector<2x8x32xf32>
    %c0_39 = arith.constant 0 : index
    %c0_40 = arith.constant 0 : index
    %c0_41 = arith.constant 0 : index
    %88 = vector.load %arg6[%c0_39, %c0_40, %c0_41] : memref<2x8x32xf32, #tpu.memory_space<vmem>>, vector<2x8x32xf32>
    tpu.vector_store %arg6[%c0_39, %c0_40, %c0_41], %87 {strides = array<i32>} : memref<2x8x32xf32, #tpu.memory_space<vmem>>, vector<2x8x32xf32>,
    return
  }
  func.func @transform_0(%arg0: i32) -> (i32, i32) {
    %c0_i32 = arith.constant 0 : i32
    %c0_i32_0 = arith.constant 0 : i32
    %c0_i32_1 = arith.constant 0 : i32
    return %c0_i32, %c0_i32_0 : i32, i32
  }
  func.func @transform_1(%arg0: i32) -> (i32, i32) {
    %c0_i32 = arith.constant 0 : i32
    %c0_i32_0 = arith.constant 0 : i32
    %c0_i32_1 = arith.constant 0 : i32
    return %c0_i32, %c0_i32_0 : i32, i32
  }
  func.func @transform_2(%arg0: i32) -> (i32, i32) {
    %c0_i32 = arith.constant 0 : i32
    %c0_i32_0 = arith.constant 0 : i32
    %c0_i32_1 = arith.constant 0 : i32
    return %c0_i32, %c0_i32_0 : i32, i32
  }
  func.func @transform_3(%arg0: i32) -> (i32, i32, i32) {
    %c0_i32 = arith.constant 0 : i32
    %c0_i32_0 = arith.constant 0 : i32
    %c0_i32_1 = arith.constant 0 : i32
    %c0_i32_2 = arith.constant 0 : i32
    return %c0_i32, %c0_i32_0, %c0_i32_1 : i32, i32, i32
  }
  func.func @transform_4(%arg0: i32) -> (i32, i32, i32) {
    %c0_i32 = arith.constant 0 : i32
    %c0_i32_0 = arith.constant 0 : i32
    %c0_i32_1 = arith.constant 0 : i32
    %c0_i32_2 = arith.constant 0 : i32
    return %c0_i32, %c0_i32_0, %c0_i32_1 : i32, i32, i32
  }
  func.func @transform_5(%arg0: i32) -> (i32, i32, i32) {
    %c0_i32 = arith.constant 0 : i32
    %c0_i32_0 = arith.constant 0 : i32
    %c0_i32_1 = arith.constant 0 : i32
    %c0_i32_2 = arith.constant 0 : i32
    return %c0_i32, %c0_i32_0, %c0_i32_1 : i32, i32, i32
  }
}

</mosaic_0001>

<bundles_post_ra>
// kernel: tpu_custom_call.1
= control target key start
LH: loop header
LB: loop body
LE: loop exit
PB: predicated region body
PF: predicated region fallthrough
CT: control target
= control target key end

     0   :  { %10 = vsyncpa [#allocation3], 0  ;;  %s1290_s0 = inlined_call_operand.hbm [shape: f32[16,32], index: 0, kind: input, shape index: {}]   ;;  %s1291_s1 = inlined_call_operand.hbm [shape: f32[16,32], index: 1, kind: input, shape index: {}]   ;;  %s1292_s2 = inlined_call_operand.hbm [shape: f32[16,32], index: 2, kind: input, shape index: {}]   ;;  %s1293_s3 = inlined_call_operand.hbm [shape: f32[3,32,32], index: 3, kind: input, shape index: {}]   ;;  %s1294_s4 = inlined_call_operand.vmem [shape: f32[3,1,32], index: 4, kind: input, shape index: {}]   ;;  %s1295_s5 = inlined_call_operand.hbm [shape: f32[2,8,32], index: 5, kind: output, shape index: {}]  }
   0x1   :  { %11 = vsyncpa [#allocation6], 0 }
   0x2   :  { %12 = vsyncpa [#allocation9], 0 }
   0x3   :  { %13 = vsyncpa [#allocation4], 0  ;;  %s31_s20 = sshll.u32 %s1291_s1, 4  ;;  %s1090_s21 = smov [#allocation5]   ;;  %s32_s20 = int_to_ptr.hbm [resolvable:$true] %s31_s20 }
   0x4   :  { %s33_s22 = sshll.u32 %s1090_s21, 4  ;;  %s18_s25 = sshll.u32 %s1290_s0, 4  ;;  %s34_s22 = int_to_ptr.vmem [resolvable:$true] %s33_s22  ;;  %s19_s25 = int_to_ptr.hbm [resolvable:$true] %s18_s25 }
   0x5   :  { %s1091_s26 = smov 128   ;;  %s1092_s27 = smov 8  }
   0x6   :  { %39 = dma.hbm_to_vmem [thread:$0]  %s32_s20, 256, %s34_s22, [#allocation6], %s1091_s26, %s1091_s26, %s1092_s27  }
   0x7   :  { %s1093_s28 = smov [#allocation2]   ;;  %s44_s1 = sshll.u32 %s1292_s2, 4  ;;  %s45_s1 = int_to_ptr.hbm [resolvable:$true] %s44_s1 }
   0x8   :  { %s20_s29 = sshll.u32 %s1093_s28, 4  ;;  %s57_s8 = sshll.u32 %s1293_s3, 4  ;;  %s21_s29 = int_to_ptr.vmem [resolvable:$true] %s20_s29  ;;  %s58_s8 = int_to_ptr.hbm [resolvable:$true] %s57_s8 }
   0x9   :  { %26 = dma.hbm_to_vmem [thread:$0]  %s19_s25, 256, %s21_s29, [#allocation3], %s1091_s26, %s1091_s26, %s1092_s27  }
   0xa   :  { %s1094_s9 = smov [#allocation7]   ;;  %s1095_s11 = smov [#allocation8]  }
   0xb   :  { %s46_s10 = sshll.u32 %s1094_s9, 4  ;;  %s59_s2 = sshll.u32 %s1095_s11, 4  ;;  %s47_s10 = int_to_ptr.vmem [resolvable:$true] %s46_s10  ;;  %s60_s2 = int_to_ptr.vmem [resolvable:$true] %s59_s2 }
   0xc   :  { %52 = dma.hbm_to_vmem [thread:$0]  %s45_s1, 256, %s47_s10, [#allocation6], %s1091_s26, %s1091_s26, %s1092_s27  }
   0xd   :  { %65 = dma.hbm_to_vmem [thread:$0]  %s58_s8, 1536, %s60_s2, [#allocation9], %s1091_s26, %s1091_s26, %s1092_s27  }
   0xe   :  { %1082 = dma.done.wait [#allocation3], 256  }
   0xf   :  { %1083 = vsyncadd [#allocation3], 4294967040 }
  0x10   :  { %1084 = dma.done.wait [#allocation6], 512  }
  0x11   :  { %1085 = vsyncadd [#allocation6], 4294966784 }
  0x12   :  { %1086 = dma.done.wait [#allocation9], 1536  }
  0x13   :  { %1087 = vsyncadd [#allocation9], 4294965760  ;;  %v89_v0 = vld [vmem:[#allocation8 + $0x18] sm:$0xff]  ;;  %v88_v2 = vld [vmem:[#allocation8 + $0x10] sm:$0xff]  ;;  %vm94_vm0 = vcmask 261120   ;;  %vm206_vm1 = vcmask 64512  }
  0x14   :  { %v130_v1 = vld [vmem:[#allocation8 + $0x38] sm:$0xff]  ;;  %113 = vmatpush.msra.mxu0 %v89_v0  ;;  %v129_v3 = vld [vmem:[#allocation8 + $0x30] sm:$0xff]  ;;  %v87_v4 = vld [vmem:[#allocation8 + $0x8] sm:$0xff]  ;;  %s1096_s15 = smov 112   ;;  %s1097_s16 = smov 120  }
  0x15   :  { %154 = vmatpush.msra.mxu1 %v130_v1  ;;  %v128_v5 = vld [vmem:[#allocation8 + $0x28] sm:$0xff]  ;;  %v86_v6 = vld [vmem:[#allocation8] sm:$0xff]  ;;  %v84_v8 = vld [vmem:[#allocation2] sm:$0xff]  ;;  %s1098_s17 = smov 104   ;;  %s1100_s20 = smov 24  }
  0x16   :  { %114 = vmatpush.msra.mxu0 %v88_v2  ;;  %v127_v7 = vld [vmem:[#allocation8 + $0x20] sm:$0xff]  ;;  %v85_v10 = vld [vmem:[#allocation2 + $0x8] sm:$0xff]  ;;  %v125_v11 = vld [vmem:[#allocation5 + $0x8] sm:$0xff]  ;;  %s1101_s21 = smov [#allocation10]   ;;  %s863_s25 = sshll.u32 %s1295_s5, 4  ;;  %s864_s25 = int_to_ptr.hbm [resolvable:$true] %s863_s25 }
  0x17   :  { %155 = vmatpush.msra.mxu1 %v129_v3  ;;  %v124_v9 = vld [vmem:[#allocation5] sm:$0xff]  ;;  %v927_v12 = vld [vmem:[%s1294_s4] ss:$0 sm:$0xff]  ;;  %v928_v13 = vld [vmem:[%s1294_s4 + $0x1] ss:$0 sm:$0xff]  ;;  %s861_s22 = sshll.u32 %s1101_s21, 4  ;;  %s862_s22 = int_to_ptr.vmem [resolvable:$true] %s861_s22 }
  0x18   :  { %115 = vmatpush.msra.mxu0 %v87_v4  ;;  %v171_v22 = vld [vmem:[#allocation8 + $0x58] sm:$0xff]  ;;  %v170_v23 = vld [vmem:[#allocation8 + $0x50] sm:$0xff]  ;;  %v169_v24 = vld [vmem:[#allocation8 + $0x48] sm:$0xff] }
  0x19   :  { %156 = vmatpush.msra.mxu1 %v128_v5  ;;  %195 = vmatpush.msra.mxu2 %v171_v22  ;;  %v168_v25 = vld [vmem:[#allocation8 + $0x40] sm:$0xff]  ;;  %v165_v26 = vld [vmem:[#allocation7] sm:$0xff]  ;;  %v166_v27 = vld [vmem:[#allocation7 + $0x8] sm:$0xff] }
  0x1a   :  { %116 = vmatpush.msra.mxu0 %v86_v6  ;;  %v929_v44 = vld [vmem:[%s1294_s4 + $0x2] ss:$0 sm:$0xff]  ;;  %s1099_s4 = smov 16  }
  0x1b   :  { %157 = vmatpush.msra.mxu1 %v127_v7  ;;  %878 = vmatmul.msk.f32.vlgmr.msra.gmra.mxu0 %vm94_vm0, %v84_v8 }
  0x1c   :  { %881 = vmatmul.msk.f32.vlgmr.msra.gmra.mxu1 %vm94_vm0, %v124_v9  ;;  %196 = vmatpush.msra.mxu2 %v170_v23 }
  0x1e   :  { %197 = vmatpush.msra.mxu2 %v169_v24 }
  0x20   :  { %198 = vmatpush.msra.mxu2 %v168_v25 }
  0x21   :  { %884 = vmatmul.msk.f32.vlgmr.msra.gmra.mxu2 %vm94_vm0, %v165_v26 }
  0x23   :  { %879 = vmatmul.msk.f32.gmra.mxu0 %vm94_vm0, %v85_v10 }
  0x24   :  { %882 = vmatmul.msk.f32.gmra.mxu1 %vm94_vm0, %v125_v11 }
  0x29   :  { %885 = vmatmul.msk.f32.gmra.mxu2 %vm94_vm0, %v166_v27 }
  0x98   :  { %v118_v14 = vpop.f32.mrf.mxu0 }
  0x99   :  { %v159_v15 = vpop.f32.mrf.mxu1  ;;  %v119_v16 = vadd.f32 %v927_v12, %v118_v14 }
  0x9a   :  { %v160_v17 = vadd.f32 %v928_v13, %v159_v15 }
  0x9b   :  { %353 = vrot.lane.b32.xlu1 %v119_v16, %s1097_s16 }
  0x9c   :  { %513 = vrot.lane.b32.xlu2 %v160_v17, %s1096_s15  ;;  %355 = vrot.lane.b32.xlu0 %v160_v17, %s1097_s16 }
  0x9d   :  { %886 = vmatpush.xpose.msk.msra.mxu3 %vm206_vm1, %v160_v17 }
  0xa0   :  { %887 = vmatmul.msk.f32.vlgmr.msra.gmra.mxu3 %vm206_vm1, %v119_v16  ;;  %v121_v18 = vpop.f32.mrf.mxu0 }
  0xa1   :  { %v162_v19 = vpop.f32.mrf.mxu1  ;;  %v122_v20 = vadd.f32 %v927_v12, %v121_v18 }
  0xa2   :  { %v163_v21 = vadd.f32 %v928_v13, %v162_v19 }
  0xa3   :  { %381 = vrot.lane.b32.xlu1 %v122_v20, %s1097_s16 }
  0xa4   :  { %541 = vrot.lane.b32.xlu2 %v163_v21, %s1096_s15  ;;  %383 = vrot.lane.b32.xlu0 %v163_v21, %s1097_s16  ;;  %v200_v45 = vpop.f32.mrf.mxu2 }
  0xa5   :  { %888 = vmatpush.xpose.msk.msrb.mxu3 %vm206_vm1, %v163_v21  ;;  %v1201_v46 = vadd.f32 %v929_v44, %v200_v45 }
  0xa8   :  { %889 = vmatmul.msk.f32.vlgmr.msrb.gmra.mxu3 %vm206_vm1, %v122_v20 }
  0xa9   :  { %325 = vmatpush.msra.mxu3 %v1201_v46 }
  0xab   :  { %539 = vrot.lane.b32.xlu1 %v122_v20, %s1096_s15 }
  0xac   :  { %669 = vrot.lane.b32.xlu2 %v160_v17, %s1098_s17  ;;  %511 = vrot.lane.b32.xlu0 %v119_v16, %s1096_s15  ;;  %v203_v47 = vpop.f32.mrf.mxu2 }
  0xad   :  { %v1204_v48 = vadd.f32 %v929_v44, %v203_v47 }
  0xaf   :  { %348 = vmatpush.msrb.mxu0 %v1204_v48  ;;  %v922_v2 = vpack.i.bf16 %v1204_v48, %v1201_v46 }
  0xb3   :  { %667 = vrot.lane.b32.xlu1 %v119_v16, %s1098_s17 }
  0xb4   :  { %695 = vrot.lane.b32.xlu2 %v122_v20, %s1098_s17  ;;  %697 = vrot.lane.b32.xlu0 %v163_v21, %s1098_s17 }
  0xf6   :  { %v514_v28 = vpop.permute.xlu2 %513 }
  0xfe   :  { %v542_v29 = vpop.permute.xlu2 %541 }
 0x106   :  { %v670_v32 = vpop.permute.xlu2 %669 }
 0x10d   :  { %v354_v31 = vpop.permute.xlu1 %353 }
 0x10e   :  { %v356_v30 = vpop.permute.xlu0 %355  ;;  %v696_v41 = vpop.permute.xlu2 %695 }
 0x10f   :  { %892 = vmatpush.xpose.msk.msrb.mxu1 %vm206_vm1, %v356_v30 }
 0x112   :  { %893 = vmatmul.msk.f32.vlgmr.msrb.gmra.mxu1 %vm206_vm1, %v354_v31 }
 0x113   :  { %898 = vmatpush.xpose.msk.msra.mxu1 %vm206_vm1, %v514_v28 }
 0x115   :  { %v382_v34 = vpop.permute.xlu1 %381 }
 0x116   :  { %v384_v33 = vpop.permute.xlu0 %383 }
 0x117   :  { %904 = vmatpush.xpose.msk.msrb.mxu1 %vm206_vm1, %v670_v32  ;;  %894 = vmatpush.xpose.msk.msrb.mxu2 %vm206_vm1, %v384_v33 }
 0x11a   :  { %895 = vmatmul.msk.f32.vlgmr.msrb.gmra.mxu2 %vm206_vm1, %v382_v34 }
 0x11b   :  { %900 = vmatpush.xpose.msk.msra.mxu2 %vm206_vm1, %v542_v29 }
 0x11d   :  { %v540_v36 = vpop.permute.xlu1 %539 }
 0x11e   :  { %v512_v35 = vpop.permute.xlu0 %511 }
 0x11f   :  { %899 = vmatmul.msk.f32.vlgmr.msra.gmra.mxu1 %vm206_vm1, %v512_v35 }
 0x122   :  { %901 = vmatmul.msk.f32.vlgmr.msra.gmra.mxu2 %vm206_vm1, %v540_v36 }
 0x123   :  { %v230_v37 = vpop.f32.mrf.mxu3 }
 0x124   :  { %v259_v38 = vsel %vm206_vm1, %v230_v37, -inf }
 0x125   :  { %260 = vmax.xlane.f32.xlu0 %v259_v38  ;;  %v668_v40 = vpop.permute.xlu1 %667 }
 0x126   :  { %v698_v39 = vpop.permute.xlu0 %697 }
 0x127   :  { %906 = vmatpush.xpose.msk.msrb.mxu2 %vm206_vm1, %v698_v39  ;;  %905 = vmatmul.msk.f32.vlgmr.msrb.gmra.mxu1 %vm206_vm1, %v668_v40 }
 0x12a   :  { %907 = vmatmul.msk.f32.vlgmr.msrb.gmra.mxu2 %vm206_vm1, %v696_v41 }
 0x12b   :  { %v256_v42 = vpop.f32.mrf.mxu3 }
 0x12c   :  { %v262_v43 = vsel %vm206_vm1, %v256_v42, -inf }
 0x12d   :  { %263 = vmax.xlane.f32.xlu1 %v262_v43 }
 0x18f   :  { %v378_v49 = vpop.f32.mrf.mxu1 }
 0x190   :  { %v409_v50 = vsel %vm206_vm1, %v378_v49, -inf }
 0x191   :  { %410 = vmax.xlane.f32.xlu2 %v409_v50 }
 0x198   :  { %v261_v51 = vpop.xlane.xlu0 %260 }
 0x199   :  { %v265_v52 = vsub.f32 %v230_v37, %v261_v51 }
 0x19b   :  { %v267_v53 = vmul.f32 1.442695, %v265_v52 }
 0x19c   :  { %v536_v54 = vpop.f32.mrf.mxu1 }
 0x19d   :  { %930 = vpow2.f32 %v267_v53  ;;  %v406_v55 = vpop.f32.mrf.mxu2  ;;  %v567_v56 = vsel %vm206_vm1, %v536_v54, -inf }
 0x19e   :  { %568 = vmax.xlane.f32.xlu0 %v567_v56  ;;  %v412_v57 = vsel %vm206_vm1, %v406_v55, -inf }
 0x19f   :  { %413 = vmax.xlane.f32.xlu2 %v412_v57 }
 0x1a0   :  { %v264_v3 = vpop.xlane.xlu1 %263 }
 0x1a1   :  { %v266_v4 = vsub.f32 %v256_v42, %v264_v3 }
 0x1a3   :  { %v1210_v58 = vpop.eup %930  ;;  %v269_v5 = vmul.f32 1.442695, %v266_v4 }
 0x1a4   :  { %v271_v59 = vsel %vm206_vm1, %v1210_v58, 0.0  ;;  %v692_v60 = vpop.f32.mrf.mxu1 }
 0x1a5   :  { %272 = vadd.xlane.f32.xlu1 %v271_v59  ;;  %v564_v61 = vpop.f32.mrf.mxu2  ;;  %v723_v62 = vsel %vm206_vm1, %v692_v60, -inf  ;;  %932 = vpow2.f32 %v269_v5 }
 0x1a6   :  { %v570_v63 = vsel %vm206_vm1, %v564_v61, -inf }
 0x1a7   :  { %724 = vmax.xlane.f32.xlu2 %v723_v62 }
 0x1ab   :  { %v1225_v6 = vpop.eup %932 }
 0x1ac   :  { %v274_v7 = vsel %vm206_vm1, %v1225_v6, 0.0 }
 0x1ad   :  { %571 = vmax.xlane.f32.xlu1 %v570_v63  ;;  %v1216_v0 = vpop.f32.mrf.mxu2 }
 0x1ae   :  { %v726_v1 = vsel %vm206_vm1, %v1216_v0, -inf }
 0x1af   :  { %727 = vmax.xlane.f32.xlu0 %v726_v1 }
 0x1bf   :  { %923 = vrot.lane.b32.xlu2 %v922_v2, %s1097_s16 }
 0x1c6   :  { %615 = vrot.lane.b32.xlu1 %v1201_v46, %s1096_s15 }
 0x1e8   :  { %275 = vadd.xlane.f32.xlu2 %v274_v7 }
 0x204   :  { %v411_v8 = vpop.xlane.xlu2 %410 }
 0x205   :  { %v415_v9 = vsub.f32 %v378_v49, %v411_v8 }
 0x207   :  { %v417_v10 = vmul.f32 1.442695, %v415_v9 }
 0x209   :  { %934 = vpow2.f32 %v417_v10 }
 0x20f   :  { %v1229_v11 = vpop.eup %934 }
 0x210   :  { %v421_v12 = vsel %vm206_vm1, %v1229_v11, 0.0 }
 0x211   :  { %422 = vadd.xlane.f32.xlu0 %v421_v12  ;;  %v569_v13 = vpop.xlane.xlu0 %568 }
 0x212   :  { %v573_v14 = vsub.f32 %v536_v54, %v569_v13  ;;  %v414_v15 = vpop.xlane.xlu2 %413 }
 0x213   :  { %v416_v16 = vsub.f32 %v406_v55, %v414_v15 }
 0x214   :  { %v575_v17 = vmul.f32 1.442695, %v573_v14 }
 0x215   :  { %v419_v18 = vmul.f32 1.442695, %v416_v16 }
 0x216   :  { %936 = vpow2.f32 %v575_v17 }
 0x217   :  { %938 = vpow2.f32 %v419_v18 }
 0x218   :  { %v273_v19 = vpop.xlane.xlu1 %272 }
 0x219   :  { %940 = vrcp.f32 %v273_v19  ;;  %v288_v32 = vand.u32 2147483648, %v273_v19  ;;  %v286_v40 = vand.u32 2147483647, %v273_v19  ;;  %vm282_vm3 = vweird.f32 %v273_v19 }
 0x21a   :  { %v725_v20 = vpop.xlane.xlu2 %724 }
 0x21b   :  { %v729_v21 = vsub.f32 %v692_v60, %v725_v20  ;;  %v289_v44 = vor.u32 1.1754944e-38, %v288_v32  ;;  %vm287_vm5 = vcmp.eq.f32.partialorder %v286_v40, 8.507059e+37 }
 0x21c   :  { %v1233_v22 = vpop.eup %936 }
 0x21d   :  { %v1235_v23 = vpop.eup %938  ;;  %v731_v24 = vmul.f32 1.442695, %v729_v21  ;;  %v579_v25 = vsel %vm206_vm1, %v1233_v22, 0.0 }
 0x21e   :  { %580 = vadd.xlane.f32.xlu2 %v579_v25  ;;  %v424_v26 = vsel %vm206_vm1, %v1235_v23, 0.0 }
 0x21f   :  { %v941_v27 = vpop.eup %940  ;;  %942 = vpow2.f32 %v731_v24  ;;  %425 = vadd.xlane.f32.xlu1 %v424_v26 }
 0x220   :  { %v278_v28 = vmul.f32 %v941_v27, %v273_v19  ;;  %v572_v29 = vpop.xlane.xlu1 %571  ;;  %vm283_vm2 = vweird.f32 %v941_v27 }
 0x221   :  { %v574_v30 = vsub.f32 %v564_v61, %v572_v29  ;;  %vm284_vm4 = vmor %vm282_vm3, %vm283_vm2 }
 0x222   :  { %v279_v31 = vsub.f32 1.0, %v278_v28  ;;  %v924_v33 = vpop.permute.xlu2 %923  ;;  %v728_v34 = vpop.xlane.xlu0 %727 }
 0x223   :  { %v577_v35 = vmul.f32 1.442695, %v574_v30  ;;  %v926_v36 = vunpack.i.h.bf16 %v924_v33  ;;  %v925_v37 = vunpack.i.l.bf16 %v924_v33  ;;  %v730_v38 = vsub.f32 %v1216_v0, %v728_v34 }
 0x224   :  { %v280_v39 = vmul.f32 %v941_v27, %v279_v31 }
 0x225   :  { %v1242_v41 = vpop.eup %942  ;;  %944 = vpow2.f32 %v577_v35  ;;  %479 = vmatpush.msrb.mxu3 %v925_v37  ;;  %506 = vmatpush.msra.mxu0 %v926_v36  ;;  %v733_v45 = vmul.f32 1.442695, %v730_v38 }
 0x226   :  { %v281_v42 = vadd.f32 %v941_v27, %v280_v39  ;;  %v735_v43 = vsel %vm206_vm1, %v1242_v41, 0.0 }
 0x227   :  { %736 = vadd.xlane.f32.xlu1 %v735_v43  ;;  %946 = vpow2.f32 %v733_v45 }
 0x228   :  { %v285_v47 = vsel %vm284_vm4, %v941_v27, %v281_v42 }
 0x229   :  { %v290_v49 = vsel %vm287_vm5, %v289_v44, %v285_v47 }
 0x22a   :  { %v305_v50 = vmul.f32 %v1210_v58, %v290_v49 }
 0x22b   :  { %v1247_v51 = vpop.eup %944 }
 0x22c   :  { %890 = vmatmul.msk.f32.vlgmr.msra.gmra.mxu3 %vm206_vm1, %v305_v50  ;;  %v582_v52 = vsel %vm206_vm1, %v1247_v51, 0.0 }
 0x22d   :  { %583 = vadd.xlane.f32.xlu0 %v582_v52  ;;  %v1252_v53 = vpop.eup %946 }
 0x22e   :  { %v738_v54 = vsel %vm206_vm1, %v1252_v53, 0.0 }
 0x235   :  { %739 = vadd.xlane.f32.xlu0 %v738_v54 }
 0x236   :  { %771 = vrot.lane.b32.xlu2 %v1201_v46, %s1098_s17 }
 0x238   :  { %v616_v55 = vpop.permute.xlu1 %615 }
 0x239   :  { %636 = vmatpush.msra.mxu3 %v616_v55 }
 0x240   :  { %797 = vrot.lane.b32.xlu1 %v1204_v48, %s1098_s17 }
 0x249   :  { %641 = vrot.lane.b32.xlu0 %v1204_v48, %s1096_s15 }
 0x25b   :  { %v276_v56 = vpop.xlane.xlu2 %275 }
 0x25c   :  { %948 = vrcp.f32 %v276_v56  ;;  %v302_v60 = vand.u32 2147483648, %v276_v56  ;;  %v300_v62 = vand.u32 2147483647, %v276_v56  ;;  %vm296_vm7 = vweird.f32 %v276_v56 }
 0x25e   :  { %v303_v46 = vor.u32 1.1754944e-38, %v302_v60  ;;  %vm301_vm9 = vcmp.eq.f32.partialorder %v300_v62, 8.507059e+37 }
 0x262   :  { %v949_v57 = vpop.eup %948 }
 0x263   :  { %v292_v58 = vmul.f32 %v949_v57, %v276_v56  ;;  %vm297_vm6 = vweird.f32 %v949_v57 }
 0x264   :  { %vm298_vm8 = vmor %vm296_vm7, %vm297_vm6 }
 0x265   :  { %v293_v59 = vsub.f32 1.0, %v292_v58 }
 0x267   :  { %v294_v61 = vmul.f32 %v949_v57, %v293_v59 }
 0x269   :  { %v295_v63 = vadd.f32 %v949_v57, %v294_v61 }
 0x26b   :  { %v299_v0 = vsel %vm298_vm8, %v949_v57, %v295_v63 }
 0x26c   :  { %v304_v1 = vsel %vm301_vm9, %v303_v46, %v299_v0 }
 0x26d   :  { %v306_v2 = vmul.f32 %v1225_v6, %v304_v1 }
 0x26f   :  { %891 = vmatmul.msk.f32.vlgmr.msrb.gmra.mxu0 %vm206_vm1, %v306_v2 }
 0x284   :  { %v423_v48 = vpop.xlane.xlu0 %422 }
 0x285   :  { %950 = vrcp.f32 %v423_v48  ;;  %v438_v7 = vand.u32 2147483648, %v423_v48  ;;  %v436_v9 = vand.u32 2147483647, %v423_v48  ;;  %vm432_vm11 = vweird.f32 %v423_v48 }
 0x287   :  { %v439_v14 = vor.u32 1.1754944e-38, %v438_v7  ;;  %vm437_vm13 = vcmp.eq.f32.partialorder %v436_v9, 8.507059e+37 }
 0x28b   :  { %v951_v3 = vpop.eup %950 }
 0x28c   :  { %v428_v4 = vmul.f32 %v951_v3, %v423_v48  ;;  %vm433_vm10 = vweird.f32 %v951_v3 }
 0x28d   :  { %vm434_vm12 = vmor %vm432_vm11, %vm433_vm10 }
 0x28e   :  { %v429_v5 = vsub.f32 1.0, %v428_v4 }
 0x290   :  { %v430_v8 = vmul.f32 %v951_v3, %v429_v5 }
 0x291   :  { %v581_v10 = vpop.xlane.xlu2 %580 }
 0x292   :  { %v431_v12 = vadd.f32 %v951_v3, %v430_v8  ;;  %952 = vrcp.f32 %v581_v10  ;;  %v426_v13 = vpop.xlane.xlu1 %425  ;;  %v596_v26 = vand.u32 2147483648, %v581_v10  ;;  %v594_v29 = vand.u32 2147483647, %v581_v10 }
 0x293   :  { %954 = vrcp.f32 %v426_v13  ;;  %v452_v30 = vand.u32 2147483648, %v426_v13  ;;  %vm590_vm2 = vweird.f32 %v581_v10  ;;  %vm446_vm4 = vweird.f32 %v426_v13 }
 0x294   :  { %v435_v6 = vsel %vm434_vm12, %v951_v3, %v431_v12  ;;  %v597_v33 = vor.u32 1.1754944e-38, %v596_v26  ;;  %vm595_vm5 = vcmp.eq.f32.partialorder %v594_v29, 8.507059e+37 }
 0x295   :  { %v440_v15 = vsel %vm437_vm13, %v439_v14, %v435_v6  ;;  %v453_v38 = vor.u32 1.1754944e-38, %v452_v30 }
 0x296   :  { %v455_v16 = vmul.f32 %v1229_v11, %v440_v15  ;;  %v450_v11 = vand.u32 2147483647, %v426_v13 }
 0x298   :  { %v953_v17 = vpop.eup %952  ;;  %896 = vmatmul.msk.f32.vlgmr.msrb.gmra.mxu3 %vm206_vm1, %v455_v16  ;;  %vm451_vm7 = vcmp.eq.f32.partialorder %v450_v11, 8.507059e+37 }
 0x299   :  { %v955_v18 = vpop.eup %954  ;;  %v586_v19 = vmul.f32 %v953_v17, %v581_v10  ;;  %v772_v20 = vpop.permute.xlu2 %771  ;;  %vm591_vm14 = vweird.f32 %v953_v17 }
 0x29a   :  { %v442_v21 = vmul.f32 %v955_v18, %v426_v13  ;;  %792 = vmatpush.msrb.mxu3 %v772_v20  ;;  %v737_v24 = vpop.xlane.xlu1 %736  ;;  %vm447_vm15 = vweird.f32 %v955_v18  ;;  %vm592_vm3 = vmor %vm590_vm2, %vm591_vm14 }
 0x29b   :  { %v587_v25 = vsub.f32 1.0, %v586_v19  ;;  %956 = vrcp.f32 %v737_v24  ;;  %vm448_vm6 = vmor %vm446_vm4, %vm447_vm15  ;;  %v752_v49 = vand.u32 2147483648, %v737_v24  ;;  %v750_v52 = vand.u32 2147483647, %v737_v24 }
 0x29c   :  { %v443_v27 = vsub.f32 1.0, %v442_v21  ;;  %vm746_vm9 = vweird.f32 %v737_v24 }
 0x29d   :  { %v588_v28 = vmul.f32 %v953_v17, %v587_v25  ;;  %v753_v58 = vor.u32 1.1754944e-38, %v752_v49  ;;  %vm751_vm11 = vcmp.eq.f32.partialorder %v750_v52, 8.507059e+37 }
 0x29e   :  { %v444_v31 = vmul.f32 %v955_v18, %v443_v27 }
 0x29f   :  { %v589_v32 = vadd.f32 %v953_v17, %v588_v28 }
 0x2a0   :  { %v445_v34 = vadd.f32 %v955_v18, %v444_v31  ;;  %v584_v35 = vpop.xlane.xlu0 %583 }
 0x2a1   :  { %v957_v36 = vpop.eup %956  ;;  %v593_v37 = vsel %vm592_vm3, %v953_v17, %v589_v32  ;;  %958 = vrcp.f32 %v584_v35  ;;  %v610_v0 = vand.u32 2147483648, %v584_v35  ;;  %vm604_vm13 = vweird.f32 %v584_v35 }
 0x2a2   :  { %v598_v39 = vsel %vm595_vm5, %v597_v33, %v593_v37  ;;  %v449_v40 = vsel %vm448_vm6, %v955_v18, %v445_v34  ;;  %v742_v42 = vmul.f32 %v957_v36, %v737_v24  ;;  %vm747_vm8 = vweird.f32 %v957_v36 }
 0x2a3   :  { %v454_v43 = vsel %vm451_vm7, %v453_v38, %v449_v40  ;;  %v613_v44 = vmul.f32 %v1233_v22, %v598_v39  ;;  %vm748_vm10 = vmor %vm746_vm9, %vm747_vm8  ;;  %v608_v2 = vand.u32 2147483647, %v584_v35  ;;  %v611_v4 = vor.u32 1.1754944e-38, %v610_v0 }
 0x2a4   :  { %v743_v45 = vsub.f32 1.0, %v742_v42  ;;  %v456_v47 = vmul.f32 %v1235_v23, %v454_v43  ;;  %vm849_vm6 = vcmask 130048   ;;  %vm852_vm7 = vcmask 195584  }
 0x2a5   :  { %902 = vmatmul.msk.f32.vlgmr.msra.gmra.mxu3 %vm206_vm1, %v613_v44  ;;  %vm609_vm15 = vcmp.eq.f32.partialorder %v608_v2, 8.507059e+37 }
 0x2a6   :  { %v744_v50 = vmul.f32 %v957_v36, %v743_v45  ;;  %897 = vmatmul.msk.f32.vlgmr.msra.gmra.mxu0 %vm206_vm1, %v456_v47 }
 0x2a7   :  { %v959_v54 = vpop.eup %958 }
 0x2a8   :  { %v745_v55 = vadd.f32 %v957_v36, %v744_v50  ;;  %v600_v56 = vmul.f32 %v959_v54, %v584_v35  ;;  %v740_v57 = vpop.xlane.xlu0 %739  ;;  %vm605_vm12 = vweird.f32 %v959_v54 }
 0x2a9   :  { %960 = vrcp.f32 %v740_v57  ;;  %vm606_vm14 = vmor %vm604_vm13, %vm605_vm12  ;;  %vm760_vm3 = vweird.f32 %v740_v57  ;;  %v764_v8 = vand.u32 2147483647, %v740_v57 }
 0x2aa   :  { %v749_v22 = vsel %vm748_vm10, %v957_v36, %v745_v55  ;;  %v601_v59 = vsub.f32 1.0, %v600_v56 }
 0x2ab   :  { %v754_v23 = vsel %vm751_vm11, %v753_v58, %v749_v22  ;;  %vm765_vm5 = vcmp.eq.f32.partialorder %v764_v8, 8.507059e+37 }
 0x2ac   :  { %v769_v60 = vmul.f32 %v1242_v41, %v754_v23  ;;  %v602_v61 = vmul.f32 %v959_v54, %v601_v59  ;;  %v766_v41 = vand.u32 2147483648, %v740_v57 }
 0x2ae   :  { %908 = vmatmul.msk.f32.vlgmr.msrb.gmra.mxu3 %vm206_vm1, %v769_v60  ;;  %v603_v46 = vadd.f32 %v959_v54, %v602_v61  ;;  %v767_v14 = vor.u32 1.1754944e-38, %v766_v41 }
 0x2af   :  { %v961_v62 = vpop.eup %960  ;;  %v327_v16 = vpop.f32.mrf.mxu3 }
 0x2b0   :  { %v756_v63 = vmul.f32 %v961_v62, %v740_v57  ;;  %v607_v48 = vsel %vm606_vm14, %v959_v54, %v603_v46  ;;  %vm761_vm2 = vweird.f32 %v961_v62 }
 0x2b1   :  { %v612_v5 = vsel %vm609_vm15, %v611_v4, %v607_v48  ;;  %vm762_vm4 = vmor %vm760_vm3, %vm761_vm2 }
 0x2b2   :  { %v757_v1 = vsub.f32 1.0, %v756_v63  ;;  %v614_v10 = vmul.f32 %v1247_v51, %v612_v5  ;;  %v798_v13 = vpop.permute.xlu1 %797 }
 0x2b4   :  { %v758_v3 = vmul.f32 %v961_v62, %v757_v1 }
 0x2b6   :  { %v759_v7 = vadd.f32 %v961_v62, %v758_v3 }
 0x2b8   :  { %v763_v12 = vsel %vm762_vm4, %v961_v62, %v759_v7 }
 0x2b9   :  { %v768_v6 = vsel %vm765_vm5, %v767_v14, %v763_v12 }
 0x2ba   :  { %v770_v15 = vmul.f32 %v1252_v53, %v768_v6 }
 0x2bb   :  { %v642_v9 = vpop.permute.xlu0 %641 }
 0x2bc   :  { %662 = vmatpush.msrb.mxu0 %v642_v9 }
 0x2bd   :  { %903 = vmatmul.msk.f32.vlgmr.msrb.gmra.mxu0 %vm206_vm1, %v614_v10 }
 0x2be   :  { %818 = vmatpush.msra.mxu0 %v798_v13 }
 0x2c5   :  { %909 = vmatmul.msk.f32.vlgmr.msra.gmra.mxu0 %vm206_vm1, %v770_v15 }
 0x2ec   :  { %v350_v17 = vpop.f32.mrf.mxu0 }
 0x31b   :  { %v481_v18 = vpop.f32.mrf.mxu3 }
 0x31c   :  { %825 = vrot.lane.b32.xlu0 %v481_v18, %s1092_s27 }
 0x323   :  { %v508_v51 = vpop.f32.mrf.mxu0 }
 0x324   :  { %827 = vrot.lane.b32.xlu2 %v508_v51, %s1092_s27 }
 0x328   :  { %v638_v19 = vpop.f32.mrf.mxu3 }
 0x329   :  { %833 = vrot.lane.b32.xlu1 %v638_v19, %s1099_s4 }
 0x331   :  { %v794_v20 = vpop.f32.mrf.mxu3 }
 0x332   :  { %841 = vrot.lane.b32.xlu2 %v794_v20, %s1100_s20 }
 0x33a   :  { %v664_v21 = vpop.f32.mrf.mxu0 }
 0x33b   :  { %835 = vrot.lane.b32.xlu0 %v664_v21, %s1099_s4 }
 0x342   :  { %v820_v24 = vpop.f32.mrf.mxu0 }
 0x343   :  { %843 = vrot.lane.b32.xlu1 %v820_v24, %s1100_s20 }
 0x37e   :  { %v828_v53 = vpop.permute.xlu2 %827 }
 0x37f   :  { %v848_v11 = vsel %vm206_vm1, %v350_v17, %v828_v53 }
 0x38c   :  { %v842_v28 = vpop.permute.xlu2 %841 }
 0x38e   :  { %v826_v25 = vpop.permute.xlu0 %825 }
 0x38f   :  { %v847_v26 = vsel %vm206_vm1, %v327_v16, %v826_v25 }
 0x39b   :  { %v834_v27 = vpop.permute.xlu1 %833 }
 0x39c   :  { %v850_v29 = vsel %vm849_vm6, %v847_v26, %v834_v27 }
 0x39d   :  { %v853_v30 = vsel %vm852_vm7, %v850_v29, %v842_v28 }
 0x39e   :  { %855 = vst.msk [vmem:[#allocation10] sm:$0xff] %vm94_vm0, %v853_v30 }
 0x3ad   :  { %v836_v31 = vpop.permute.xlu0 %835 }
 0x3ae   :  { %v851_v32 = vsel %vm849_vm6, %v848_v11, %v836_v31 }
 0x3b5   :  { %v844_v33 = vpop.permute.xlu1 %843 }
 0x3b6   :  { %v854_v34 = vsel %vm852_vm7, %v851_v32, %v844_v33 }
 0x3b7   :  { %856 = vst.msk [vmem:[#allocation10 + $0x8] sm:$0xff] %vm94_vm0, %v854_v34 }
 0x3b8   :  { %869 = dma.vmem_to_hbm [thread:$0]  %s862_s22, 256, %s864_s25, [#allocation4], %s1091_s26, %s1091_s26, %s1092_s27  }
 0x3b9   :  { %1088 = dma.done.wait [#allocation4], 256  }
 0x3ba   :  { %1089 = vsyncadd [#allocation4], 4294967040 }
 0x3bb   :  { %874 = vsyncpa [#allocation3], 1 }
 0x3bc   :  { %875 = vsyncpa [#allocation6], 1 }
 0x3bd   :  { %876 = vsyncpa [#allocation9], 1 }
 0x3be   :  { %877 = vsyncpa [#allocation4], 1 }

</bundles_post_ra>
